<compile_context>
chip_gen: v6e
topology: v6e:2x2x1
jax: 0.10.0
libtpu: 0.0.40
codegen_flags: <defaults>
</compile_context>

<pallas_src>
import functools

import jax
import jax.numpy as jnp
from jax.experimental import pallas as pl
from jax.experimental.pallas import tpu as pltpu


def _temporal_attention_kernel(x_ref, wqkv_ref, wo_ref, vecs_ref, o_ref, *,
                               num_heads):
    B_t, S, E = x_ref.shape
    H = num_heads
    Dh = E // H
    scale = 1.0 / (float(Dh) ** 0.5)

    x = x_ref[...].astype(jnp.float32)            # [Bt, S, E]
    x2 = x.reshape(B_t * S, E)                    # flatten: fill MXU M-dim

    vecs = vecs_ref[...]                          # [8, E] merged vectors
    b_q, b_k, b_v = vecs[0:1, :], vecs[1:2, :], vecs[2:3, :]
    b_o, gamma, beta = vecs[3:4, :], vecs[4:5, :], vecs[5:6, :]

    # --- fused QKV projection (one matmul, N = 3E) -------------------------
    qkv = jnp.dot(x2, wqkv_ref[...], preferred_element_type=jnp.float32)
    q = (qkv[:, 0 * E:1 * E] + b_q).reshape(B_t, S, E)
    k = (qkv[:, 1 * E:2 * E] + b_k).reshape(B_t, S, E)
    v = (qkv[:, 2 * E:3 * E] + b_v).reshape(B_t, S, E)

    # --- per-head scaled-dot-product attention -----------------------------
    head_outs = []
    for h in range(H):                            # static unrolled loop, H small
        lo, hi = h * Dh, (h + 1) * Dh
        qh = q[:, :, lo:hi] * scale               # [Bt, S, Dh]
        kh = k[:, :, lo:hi]
        vh = v[:, :, lo:hi]
        s = jnp.einsum('bqd,bkd->bqk', qh, kh,
                       preferred_element_type=jnp.float32)   # [Bt, S, S]
        m = jnp.max(s, axis=-1, keepdims=True)
        p = jnp.exp(s - m)                                    # EUP
        p = p / jnp.sum(p, axis=-1, keepdims=True)
        oh = jnp.einsum('bqk,bkd->bqd', p, vh,
                        preferred_element_type=jnp.float32)  # [Bt, S, Dh]
        head_outs.append(oh)
    attn = jnp.concatenate(head_outs, axis=-1).reshape(B_t * S, E)

    # --- output projection (dropout: eval mode -> identity) ----------------
    attn_out = jnp.dot(attn, wo_ref[...],
                       preferred_element_type=jnp.float32) + b_o

    # --- residual + LayerNorm (biased variance, eps = 1e-5) -----------------
    z = x2 + attn_out
    mean = jnp.mean(z, axis=-1, keepdims=True)
    cent = z - mean
    var = jnp.mean(cent * cent, axis=-1, keepdims=True)
    y = cent * jax.lax.rsqrt(var + 1e-5) * gamma + beta

    o_ref[...] = y.reshape(B_t, S, E).astype(o_ref.dtype)


def temporal_attention(x, params, *, num_heads, tile_b=None):
    """x: [B, S, E] float32.  params: dict with 'w_qkv' [E,3E], 'w_o' [E,E],
    'vecs' [8,E] (rows: b_q, b_k, b_v, b_out, gamma, beta, 0, 0)."""
    B, S, E = x.shape
    assert E % num_heads == 0, "embed_dim must be divisible by num_heads"

    if tile_b is None:
        # Explicit batch tile: always >= 2 grid programs when B >= 2 (megacore
        # sharding + DMA/compute overlap), capped at 256 rows so per-step VMEM
        # stays small on all generations (including v7x's 64 MiB).
        tile_b = max(1, min(256, pl.cdiv(B, 2)))

    grid = (pl.cdiv(B, tile_b),)
    kernel = functools.partial(_temporal_attention_kernel, num_heads=num_heads)
    full = lambda shape: pl.BlockSpec(shape, lambda i: (0,) * len(shape))

    return pl.pallas_call(
        kernel,
        out_shape=jax.ShapeDtypeStruct((B, S, E), x.dtype),
        grid_spec=pltpu.PrefetchScalarGridSpec(
            num_scalar_prefetch=0,
            grid=grid,
            in_specs=[
                pl.BlockSpec((tile_b, S, E), lambda i: (i, 0, 0)),  # x
                full((E, 3 * E)),                                   # W_qkv
                full((E, E)),                                       # W_out
                full((8, E)),                                       # merged vectors
            ],
            out_specs=pl.BlockSpec((tile_b, S, E), lambda i: (i, 0, 0)),
        ),
        compiler_params=pltpu.CompilerParams(
            dimension_semantics=("parallel",)),
    )(x, params["w_qkv"], params["w_o"], params["vecs"])


def _reference(x, params, num_heads):
    """Pure-JAX mirror of torch.nn.MultiheadAttention + residual LayerNorm."""
    B, S, E = x.shape
    H = num_heads
    Dh = E // H
    vecs = params["vecs"]
    b_q, b_k, b_v, b_o, gamma, beta = (vecs[i] for i in range(6))

    qkv = x @ params["w_qkv"]
    q = qkv[..., :E] + b_q
    k = qkv[..., E:2 * E] + b_k
    v = qkv[..., 2 * E:] + b_v

    qh = q.reshape(B, S, H, Dh).transpose(0, 2, 1, 3) * (1.0 / (float(Dh) ** 0.5))
    kh = k.reshape(B, S, H, Dh).transpose(0, 2, 1, 3)
    vh = v.reshape(B, S, H, Dh).transpose(0, 2, 1, 3)

    s = jnp.einsum('bhqd,bhkd->bhqk', qh, kh)
    p = jax.nn.softmax(s, axis=-1)
    o = jnp.einsum('bhqk,bhkd->bhqd', p, vh)
    o = o.transpose(0, 2, 1, 3).reshape(B, S, E)

    attn_out = o @ params["w_o"] + b_o
    z = x + attn_out
    mean = jnp.mean(z, axis=-1, keepdims=True)
    var = jnp.mean((z - mean) ** 2, axis=-1, keepdims=True)
    return (z - mean) * jax.lax.rsqrt(var + 1e-5) * gamma + beta


def init_params(key, hidden_dim):
    """Deterministic synthetic init (PyTorch-Linear-style uniform ranges).
    Weights stored pre-transposed as [in, out]."""
    E = hidden_dim
    ks = jax.random.split(key, 4)
    bound = 1.0 / jnp.sqrt(jnp.float32(E))
    u = lambda k, shape: jax.random.uniform(k, shape, jnp.float32, -bound, bound)

    w_qkv = u(ks[0], (E, 3 * E))     # = in_proj_weight.T
    w_o = u(ks[1], (E, E))           # = out_proj.weight.T
    b_qkv = u(ks[2], (3 * E,))
    b_o = u(ks[3], (E,))

    vecs = jnp.zeros((8, E), jnp.float32)
    vecs = vecs.at[0].set(b_qkv[:E])          # b_q
    vecs = vecs.at[1].set(b_qkv[E:2 * E])     # b_k
    vecs = vecs.at[2].set(b_qkv[2 * E:])      # b_v
    vecs = vecs.at[3].set(b_o)                # out-proj bias
    vecs = vecs.at[4].set(jnp.ones((E,), jnp.float32))   # LayerNorm gamma
    vecs = vecs.at[5].set(jnp.zeros((E,), jnp.float32))  # LayerNorm beta
    return {"w_qkv": w_qkv, "w_o": w_o, "vecs": vecs}


if __name__ == "__main__":
    B, S, E, H = 2, 8, 32, 4   # batch=2, seq=8, hidden=32, heads=4
    key = jax.random.PRNGKey(0)
    kx, kp = jax.random.split(key)
    x = jax.random.normal(kx, (B, S, E), jnp.float32)
    params = init_params(kp, E)

    out = temporal_attention(x, params, num_heads=H)
    out = jax.block_until_ready(out)

    ref = _reference(x, params, H)
    assert out.shape == (B, S, E)
    assert jnp.allclose(out, ref, atol=1e-4, rtol=1e-4), "mismatch vs JAX reference"
    print("KERNEL_OK")
</pallas_src>

<mosaic_0001>
module attributes {stable_mosaic.version = 11 : i64} {
  func.func @_temporal_attention_kernel(%arg0: i32, %arg1: memref<1x8x32xf32, #tpu.memory_space<vmem>>, %arg2: memref<32x96xf32, #tpu.memory_space<vmem>>, %arg3: memref<32x32xf32, #tpu.memory_space<vmem>>, %arg4: memref<8x32xf32, #tpu.memory_space<vmem>>, %arg5: memref<1x8x32xf32, #tpu.memory_space<vmem>>) attributes {dimension_semantics = [#tpu.dimension_semantics<parallel>], iteration_bounds = array<i64: 2>, scalar_prefetch = 0 : i64, scratch_operands = 0 : i64, tpu.core_type = #tpu.core_type<tc>, window_params = [{transform_indices = @transform_0, window_bounds = array<i64: 1, 8, 32>}, {pipeline_mode = #tpu.pipeline_mode<synchronous>, transform_indices = @transform_1, window_bounds = array<i64: 32, 96>}, {pipeline_mode = #tpu.pipeline_mode<synchronous>, transform_indices = @transform_2, window_bounds = array<i64: 32, 32>}, {pipeline_mode = #tpu.pipeline_mode<synchronous>, transform_indices = @transform_3, window_bounds = array<i64: 8, 32>}, {transform_indices = @transform_4, window_bounds = array<i64: 1, 8, 32>}]} {
    %c0 = arith.constant 0 : index
    %c0_0 = arith.constant 0 : index
    %c0_1 = arith.constant 0 : index
    %0 = vector.load %arg1[%c0, %c0_0, %c0_1] : memref<1x8x32xf32, #tpu.memory_space<vmem>>, vector<1x8x32xf32>
    %1 = vector.shape_cast %0 : vector<1x8x32xf32> to vector<8x32xf32>
    %c0_2 = arith.constant 0 : index
    %c0_3 = arith.constant 0 : index
    %2 = vector.load %arg4[%c0_2, %c0_3] : memref<8x32xf32, #tpu.memory_space<vmem>>, vector<8x32xf32>
    %3 = vector.extract_strided_slice %2 {offsets = [0, 0], sizes = [1, 32], strides = [1, 1]} : vector<8x32xf32> to vector<1x32xf32>
    %4 = vector.extract_strided_slice %2 {offsets = [1, 0], sizes = [1, 32], strides = [1, 1]} : vector<8x32xf32> to vector<1x32xf32>
    %5 = vector.extract_strided_slice %2 {offsets = [2, 0], sizes = [1, 32], strides = [1, 1]} : vector<8x32xf32> to vector<1x32xf32>
    %6 = vector.extract_strided_slice %2 {offsets = [3, 0], sizes = [1, 32], strides = [1, 1]} : vector<8x32xf32> to vector<1x32xf32>
    %7 = vector.extract_strided_slice %2 {offsets = [4, 0], sizes = [1, 32], strides = [1, 1]} : vector<8x32xf32> to vector<1x32xf32>
    %8 = vector.extract_strided_slice %2 {offsets = [5, 0], sizes = [1, 32], strides = [1, 1]} : vector<8x32xf32> to vector<1x32xf32>
    %c0_4 = arith.constant 0 : index
    %c0_5 = arith.constant 0 : index
    %9 = vector.load %arg2[%c0_4, %c0_5] : memref<32x96xf32, #tpu.memory_space<vmem>>, vector<32x96xf32>
    %cst = arith.constant dense<0.000000e+00> : vector<8x96xf32>
    %10 = tpu.matmul %1, %9, %cst {dimension_numbers = #tpu.dot_dimension_numbers<[1], [0], [0], [1], [0, 0, 1, 1], [], []>} : vector<8x32xf32>, vector<32x96xf32>, vector<8x96xf32> -> vector<8x96xf32>
    %11 = vector.extract_strided_slice %10 {offsets = [0, 0], sizes = [8, 32], strides = [1, 1]} : vector<8x96xf32> to vector<8x32xf32>
    %12 = vector.broadcast %3 : vector<1x32xf32> to vector<8x32xf32>
    %13 = arith.addf %11, %12 : vector<8x32xf32>
    %14 = vector.shape_cast %13 : vector<8x32xf32> to vector<1x8x32xf32>
    %15 = vector.extract_strided_slice %10 {offsets = [0, 32], sizes = [8, 32], strides = [1, 1]} : vector<8x96xf32> to vector<8x32xf32>
    %16 = vector.broadcast %4 : vector<1x32xf32> to vector<8x32xf32>
    %17 = arith.addf %15, %16 : vector<8x32xf32>
    %18 = vector.shape_cast %17 : vector<8x32xf32> to vector<1x8x32xf32>
    %19 = vector.extract_strided_slice %10 {offsets = [0, 64], sizes = [8, 32], strides = [1, 1]} : vector<8x96xf32> to vector<8x32xf32>
    %20 = vector.broadcast %5 : vector<1x32xf32> to vector<8x32xf32>
    %21 = arith.addf %19, %20 : vector<8x32xf32>
    %22 = vector.shape_cast %21 : vector<8x32xf32> to vector<1x8x32xf32>
    %23 = vector.extract_strided_slice %14 {offsets = [0, 0, 0], sizes = [1, 8, 8], strides = [1, 1, 1]} : vector<1x8x32xf32> to vector<1x8x8xf32>
    %cst_6 = arith.constant 0.353553385 : f32
    %24 = vector.broadcast %cst_6 : f32 to vector<1x8x8xf32>
    %25 = arith.mulf %23, %24 : vector<1x8x8xf32>
    %26 = vector.extract_strided_slice %18 {offsets = [0, 0, 0], sizes = [1, 8, 8], strides = [1, 1, 1]} : vector<1x8x32xf32> to vector<1x8x8xf32>
    %27 = vector.extract_strided_slice %22 {offsets = [0, 0, 0], sizes = [1, 8, 8], strides = [1, 1, 1]} : vector<1x8x32xf32> to vector<1x8x8xf32>
    "tpu.trace_start"() <{level = 10 : i32, message = "bqd,bkd->bqk"}> : () -> ()
    %cst_7 = arith.constant dense<0.000000e+00> : vector<1x8x8xf32>
    %28 = tpu.matmul %25, %26, %cst_7 {dimension_numbers = #tpu.dot_dimension_numbers<[2], [2], [1], [1], [0, 0, 0, 1, 1, 1], [0], [0]>} : vector<1x8x8xf32>, vector<1x8x8xf32>, vector<1x8x8xf32> -> vector<1x8x8xf32>
    "tpu.trace_stop"() : () -> ()
    %cst_8 = arith.constant dense<0xFF800000> : vector<1x8xf32>
    %29 = vector.multi_reduction <maximumf>, %28, %cst_8 [2] : vector<1x8x8xf32> to vector<1x8xf32>
    %30 = vector.shape_cast %29 : vector<1x8xf32> to vector<1x8x1xf32>
    %31 = vector.broadcast %30 : vector<1x8x1xf32> to vector<1x8x8xf32>
    %32 = arith.subf %28, %31 : vector<1x8x8xf32>
    %33 = math.exp %32 : vector<1x8x8xf32>
    %cst_9 = arith.constant dense<0.000000e+00> : vector<1x8xf32>
    %34 = vector.multi_reduction <add>, %33, %cst_9 [2] : vector<1x8x8xf32> to vector<1x8xf32>
    %35 = vector.shape_cast %34 : vector<1x8xf32> to vector<1x8x1xf32>
    %36 = vector.broadcast %35 : vector<1x8x1xf32> to vector<1x8x8xf32>
    %37 = arith.divf %33, %36 : vector<1x8x8xf32>
    "tpu.trace_start"() <{level = 10 : i32, message = "bqk,bkd->bqd"}> : () -> ()
    %cst_10 = arith.constant dense<0.000000e+00> : vector<1x8x8xf32>
    %38 = tpu.matmul %37, %27, %cst_10 {dimension_numbers = #tpu.dot_dimension_numbers<[2], [1], [1], [2], [0, 0, 0, 1, 1, 2], [0], [0]>} : vector<1x8x8xf32>, vector<1x8x8xf32>, vector<1x8x8xf32> -> vector<1x8x8xf32>
    "tpu.trace_stop"() : () -> ()
    %39 = vector.extract_strided_slice %14 {offsets = [0, 0, 8], sizes = [1, 8, 8], strides = [1, 1, 1]} : vector<1x8x32xf32> to vector<1x8x8xf32>
    %cst_11 = arith.constant 0.353553385 : f32
    %40 = vector.broadcast %cst_11 : f32 to vector<1x8x8xf32>
    %41 = arith.mulf %39, %40 : vector<1x8x8xf32>
    %42 = vector.extract_strided_slice %18 {offsets = [0, 0, 8], sizes = [1, 8, 8], strides = [1, 1, 1]} : vector<1x8x32xf32> to vector<1x8x8xf32>
    %43 = vector.extract_strided_slice %22 {offsets = [0, 0, 8], sizes = [1, 8, 8], strides = [1, 1, 1]} : vector<1x8x32xf32> to vector<1x8x8xf32>
    "tpu.trace_start"() <{level = 10 : i32, message = "bqd,bkd->bqk"}> : () -> ()
    %cst_12 = arith.constant dense<0.000000e+00> : vector<1x8x8xf32>
    %44 = tpu.matmul %41, %42, %cst_12 {dimension_numbers = #tpu.dot_dimension_numbers<[2], [2], [1], [1], [0, 0, 0, 1, 1, 1], [0], [0]>} : vector<1x8x8xf32>, vector<1x8x8xf32>, vector<1x8x8xf32> -> vector<1x8x8xf32>
    "tpu.trace_stop"() : () -> ()
    %cst_13 = arith.constant dense<0xFF800000> : vector<1x8xf32>
    %45 = vector.multi_reduction <maximumf>, %44, %cst_13 [2] : vector<1x8x8xf32> to vector<1x8xf32>
    %46 = vector.shape_cast %45 : vector<1x8xf32> to vector<1x8x1xf32>
    %47 = vector.broadcast %46 : vector<1x8x1xf32> to vector<1x8x8xf32>
    %48 = arith.subf %44, %47 : vector<1x8x8xf32>
    %49 = math.exp %48 : vector<1x8x8xf32>
    %cst_14 = arith.constant dense<0.000000e+00> : vector<1x8xf32>
    %50 = vector.multi_reduction <add>, %49, %cst_14 [2] : vector<1x8x8xf32> to vector<1x8xf32>
    %51 = vector.shape_cast %50 : vector<1x8xf32> to vector<1x8x1xf32>
    %52 = vector.broadcast %51 : vector<1x8x1xf32> to vector<1x8x8xf32>
    %53 = arith.divf %49, %52 : vector<1x8x8xf32>
    "tpu.trace_start"() <{level = 10 : i32, message = "bqk,bkd->bqd"}> : () -> ()
    %cst_15 = arith.constant dense<0.000000e+00> : vector<1x8x8xf32>
    %54 = tpu.matmul %53, %43, %cst_15 {dimension_numbers = #tpu.dot_dimension_numbers<[2], [1], [1], [2], [0, 0, 0, 1, 1, 2], [0], [0]>} : vector<1x8x8xf32>, vector<1x8x8xf32>, vector<1x8x8xf32> -> vector<1x8x8xf32>
    "tpu.trace_stop"() : () -> ()
    %55 = vector.extract_strided_slice %14 {offsets = [0, 0, 16], sizes = [1, 8, 8], strides = [1, 1, 1]} : vector<1x8x32xf32> to vector<1x8x8xf32>
    %cst_16 = arith.constant 0.353553385 : f32
    %56 = vector.broadcast %cst_16 : f32 to vector<1x8x8xf32>
    %57 = arith.mulf %55, %56 : vector<1x8x8xf32>
    %58 = vector.extract_strided_slice %18 {offsets = [0, 0, 16], sizes = [1, 8, 8], strides = [1, 1, 1]} : vector<1x8x32xf32> to vector<1x8x8xf32>
    %59 = vector.extract_strided_slice %22 {offsets = [0, 0, 16], sizes = [1, 8, 8], strides = [1, 1, 1]} : vector<1x8x32xf32> to vector<1x8x8xf32>
    "tpu.trace_start"() <{level = 10 : i32, message = "bqd,bkd->bqk"}> : () -> ()
    %cst_17 = arith.constant dense<0.000000e+00> : vector<1x8x8xf32>
    %60 = tpu.matmul %57, %58, %cst_17 {dimension_numbers = #tpu.dot_dimension_numbers<[2], [2], [1], [1], [0, 0, 0, 1, 1, 1], [0], [0]>} : vector<1x8x8xf32>, vector<1x8x8xf32>, vector<1x8x8xf32> -> vector<1x8x8xf32>
    "tpu.trace_stop"() : () -> ()
    %cst_18 = arith.constant dense<0xFF800000> : vector<1x8xf32>
    %61 = vector.multi_reduction <maximumf>, %60, %cst_18 [2] : vector<1x8x8xf32> to vector<1x8xf32>
    %62 = vector.shape_cast %61 : vector<1x8xf32> to vector<1x8x1xf32>
    %63 = vector.broadcast %62 : vector<1x8x1xf32> to vector<1x8x8xf32>
    %64 = arith.subf %60, %63 : vector<1x8x8xf32>
    %65 = math.exp %64 : vector<1x8x8xf32>
    %cst_19 = arith.constant dense<0.000000e+00> : vector<1x8xf32>
    %66 = vector.multi_reduction <add>, %65, %cst_19 [2] : vector<1x8x8xf32> to vector<1x8xf32>
    %67 = vector.shape_cast %66 : vector<1x8xf32> to vector<1x8x1xf32>
    %68 = vector.broadcast %67 : vector<1x8x1xf32> to vector<1x8x8xf32>
    %69 = arith.divf %65, %68 : vector<1x8x8xf32>
    "tpu.trace_start"() <{level = 10 : i32, message = "bqk,bkd->bqd"}> : () -> ()
    %cst_20 = arith.constant dense<0.000000e+00> : vector<1x8x8xf32>
    %70 = tpu.matmul %69, %59, %cst_20 {dimension_numbers = #tpu.dot_dimension_numbers<[2], [1], [1], [2], [0, 0, 0, 1, 1, 2], [0], [0]>} : vector<1x8x8xf32>, vector<1x8x8xf32>, vector<1x8x8xf32> -> vector<1x8x8xf32>
    "tpu.trace_stop"() : () -> ()
    %71 = vector.extract_strided_slice %14 {offsets = [0, 0, 24], sizes = [1, 8, 8], strides = [1, 1, 1]} : vector<1x8x32xf32> to vector<1x8x8xf32>
    %cst_21 = arith.constant 0.353553385 : f32
    %72 = vector.broadcast %cst_21 : f32 to vector<1x8x8xf32>
    %73 = arith.mulf %71, %72 : vector<1x8x8xf32>
    %74 = vector.extract_strided_slice %18 {offsets = [0, 0, 24], sizes = [1, 8, 8], strides = [1, 1, 1]} : vector<1x8x32xf32> to vector<1x8x8xf32>
    %75 = vector.extract_strided_slice %22 {offsets = [0, 0, 24], sizes = [1, 8, 8], strides = [1, 1, 1]} : vector<1x8x32xf32> to vector<1x8x8xf32>
    "tpu.trace_start"() <{level = 10 : i32, message = "bqd,bkd->bqk"}> : () -> ()
    %cst_22 = arith.constant dense<0.000000e+00> : vector<1x8x8xf32>
    %76 = tpu.matmul %73, %74, %cst_22 {dimension_numbers = #tpu.dot_dimension_numbers<[2], [2], [1], [1], [0, 0, 0, 1, 1, 1], [0], [0]>} : vector<1x8x8xf32>, vector<1x8x8xf32>, vector<1x8x8xf32> -> vector<1x8x8xf32>
    "tpu.trace_stop"() : () -> ()
    %cst_23 = arith.constant dense<0xFF800000> : vector<1x8xf32>
    %77 = vector.multi_reduction <maximumf>, %76, %cst_23 [2] : vector<1x8x8xf32> to vector<1x8xf32>
    %78 = vector.shape_cast %77 : vector<1x8xf32> to vector<1x8x1xf32>
    %79 = vector.broadcast %78 : vector<1x8x1xf32> to vector<1x8x8xf32>
    %80 = arith.subf %76, %79 : vector<1x8x8xf32>
    %81 = math.exp %80 : vector<1x8x8xf32>
    %cst_24 = arith.constant dense<0.000000e+00> : vector<1x8xf32>
    %82 = vector.multi_reduction <add>, %81, %cst_24 [2] : vector<1x8x8xf32> to vector<1x8xf32>
    %83 = vector.shape_cast %82 : vector<1x8xf32> to vector<1x8x1xf32>
    %84 = vector.broadcast %83 : vector<1x8x1xf32> to vector<1x8x8xf32>
    %85 = arith.divf %81, %84 : vector<1x8x8xf32>
    "tpu.trace_start"() <{level = 10 : i32, message = "bqk,bkd->bqd"}> : () -> ()
    %cst_25 = arith.constant dense<0.000000e+00> : vector<1x8x8xf32>
    %86 = tpu.matmul %85, %75, %cst_25 {dimension_numbers = #tpu.dot_dimension_numbers<[2], [1], [1], [2], [0, 0, 0, 1, 1, 2], [0], [0]>} : vector<1x8x8xf32>, vector<1x8x8xf32>, vector<1x8x8xf32> -> vector<1x8x8xf32>
    "tpu.trace_stop"() : () -> ()
    %87 = tpu.concatenate %38, %54, %70, %86 in 2 : vector<1x8x8xf32>, vector<1x8x8xf32>, vector<1x8x8xf32>, vector<1x8x8xf32> -> vector<1x8x32xf32>
    %88 = vector.shape_cast %87 : vector<1x8x32xf32> to vector<8x32xf32>
    %c0_26 = arith.constant 0 : index
    %c0_27 = arith.constant 0 : index
    %89 = vector.load %arg3[%c0_26, %c0_27] : memref<32x32xf32, #tpu.memory_space<vmem>>, vector<32x32xf32>
    %cst_28 = arith.constant dense<0.000000e+00> : vector<8x32xf32>
    %90 = tpu.matmul %88, %89, %cst_28 {dimension_numbers = #tpu.dot_dimension_numbers<[1], [0], [0], [1], [0, 0, 1, 1], [], []>} : vector<8x32xf32>, vector<32x32xf32>, vector<8x32xf32> -> vector<8x32xf32>
    %91 = vector.broadcast %6 : vector<1x32xf32> to vector<8x32xf32>
    %92 = arith.addf %90, %91 : vector<8x32xf32>
    %93 = arith.addf %1, %92 : vector<8x32xf32>
    %cst_29 = arith.constant dense<0.000000e+00> : vector<8xf32>
    %94 = vector.multi_reduction <add>, %93, %cst_29 [1] : vector<8x32xf32> to vector<8xf32>
    %95 = vector.shape_cast %94 : vector<8xf32> to vector<8x1xf32>
    %cst_30 = arith.constant 3.200000e+01 : f32
    %96 = vector.broadcast %cst_30 : f32 to vector<8x1xf32>
    %97 = arith.divf %95, %96 : vector<8x1xf32>
    %98 = vector.broadcast %97 : vector<8x1xf32> to vector<8x32xf32>
    %99 = arith.subf %93, %98 : vector<8x32xf32>
    %100 = arith.mulf %99, %99 : vector<8x32xf32>
    %cst_31 = arith.constant dense<0.000000e+00> : vector<8xf32>
    %101 = vector.multi_reduction <add>, %100, %cst_31 [1] : vector<8x32xf32> to vector<8xf32>
    %102 = vector.shape_cast %101 : vector<8xf32> to vector<8x1xf32>
    %cst_32 = arith.constant 3.200000e+01 : f32
    %103 = vector.broadcast %cst_32 : f32 to vector<8x1xf32>
    %104 = arith.divf %102, %103 : vector<8x1xf32>
    %cst_33 = arith.constant 9.99999974E-6 : f32
    %105 = vector.broadcast %cst_33 : f32 to vector<8x1xf32>
    %106 = arith.addf %104, %105 : vector<8x1xf32>
    %107 = math.rsqrt %106 : vector<8x1xf32>
    %108 = vector.broadcast %107 : vector<8x1xf32> to vector<8x32xf32>
    %109 = arith.mulf %99, %108 : vector<8x32xf32>
    %110 = vector.broadcast %7 : vector<1x32xf32> to vector<8x32xf32>
    %111 = arith.mulf %109, %110 : vector<8x32xf32>
    %112 = vector.broadcast %8 : vector<1x32xf32> to vector<8x32xf32>
    %113 = arith.addf %111, %112 : vector<8x32xf32>
    %114 = vector.shape_cast %113 : vector<8x32xf32> to vector<1x8x32xf32>
    %c0_34 = arith.constant 0 : index
    %c0_35 = arith.constant 0 : index
    %c0_36 = arith.constant 0 : index
    %115 = vector.load %arg5[%c0_34, %c0_35, %c0_36] : memref<1x8x32xf32, #tpu.memory_space<vmem>>, vector<1x8x32xf32>
    tpu.vector_store %arg5[%c0_34, %c0_35, %c0_36], %114 {strides = array<i32>} : memref<1x8x32xf32, #tpu.memory_space<vmem>>, vector<1x8x32xf32>,
    return
  }
  func.func @transform_0(%arg0: i32) -> (i32, i32, i32) {
    %c0_i32 = arith.constant 0 : i32
    %c0_i32_0 = arith.constant 0 : i32
    %c0_i32_1 = arith.constant 0 : i32
    return %arg0, %c0_i32, %c0_i32_0 : i32, i32, i32
  }
  func.func @transform_1(%arg0: i32) -> (i32, i32) {
    %c0_i32 = arith.constant 0 : i32
    %c0_i32_0 = arith.constant 0 : i32
    %c0_i32_1 = arith.constant 0 : i32
    return %c0_i32, %c0_i32_0 : i32, i32
  }
  func.func @transform_2(%arg0: i32) -> (i32, i32) {
    %c0_i32 = arith.constant 0 : i32
    %c0_i32_0 = arith.constant 0 : i32
    %c0_i32_1 = arith.constant 0 : i32
    return %c0_i32, %c0_i32_0 : i32, i32
  }
  func.func @transform_3(%arg0: i32) -> (i32, i32) {
    %c0_i32 = arith.constant 0 : i32
    %c0_i32_0 = arith.constant 0 : i32
    %c0_i32_1 = arith.constant 0 : i32
    return %c0_i32, %c0_i32_0 : i32, i32
  }
  func.func @transform_4(%arg0: i32) -> (i32, i32, i32) {
    %c0_i32 = arith.constant 0 : i32
    %c0_i32_0 = arith.constant 0 : i32
    %c0_i32_1 = arith.constant 0 : i32
    return %arg0, %c0_i32, %c0_i32_0 : i32, i32, i32
  }
}

</mosaic_0001>

<bundles_post_ra>
// kernel: tpu_custom_call.1
= control target key start
LH: loop header
LB: loop body
LE: loop exit
PB: predicated region body
PF: predicated region fallthrough
CT: control target
= control target key end

     0   :  { %9 = vsyncpa [#allocation3], 0  ;;  %s1993_s0 = inlined_call_operand.hbm [shape: f32[2,8,32], index: 0, kind: input, shape index: {}]   ;;  %s1994_s1 = inlined_call_operand.hbm [shape: f32[32,96], index: 1, kind: input, shape index: {}]   ;;  %s1995_s2 = inlined_call_operand.hbm [shape: f32[32,32], index: 2, kind: input, shape index: {}]   ;;  %s1996_s3 = inlined_call_operand.hbm [shape: f32[8,32], index: 3, kind: input, shape index: {}]   ;;  %s1997_s4 = inlined_call_operand.hbm [shape: f32[2,8,32], index: 4, kind: output, shape index: {}]  }
   0x1   :  { %11 = vsyncpa [#allocation3 + $0x1], 0 }
   0x2   :  { %12 = vsyncpa [#allocation6], 0 }
   0x3   :  { %13 = vsyncpa [#allocation9], 0 }
   0x4   :  { %14 = vsyncpa [#allocation4], 0 }
   0x5   :  { %16 = vsyncpa [#allocation4 + $0x1], 0  ;;  %s1721_s15 = smov 0   ;;  %s1723_s16 = smov 0  }
   0x6   :  { %s1725_s17 = smov 0   ;;  %s1727_s18 = smov 0  }
   0x7 LB: > { %s1742_s19 = sadd.s32 4294967295, %s1670_s18   ;;  %s1258_s20 = sadd.s32 4294967294, %s1670_s18   ;;  %s1670_s18 = sphi %s1727_s18, %s2021_s18   ;;  %s1666_s17 = sphi %s1725_s17, %s2020_s17   ;;  %s1662_s16 = sphi %s1723_s16, %s2019_s16   ;;  %s1658_s15 = sphi %s1721_s15, %s2018_s15  }
   0x8   : > { %p42_p0 = scmp.ne.s32.totalorder %s1662_s16, %s1658_s15  ;;  %p1998_p1 = scmp.eq.s32.totalorder %s1742_s19, 0 }
   0x9   : > { %p135_p3 = scmp.eq.s32.totalorder %s1258_s20, 1  ;;  %p1259_p5 = scmp.ge.s32.totalorder %s1670_s18, 1 }
   0xa   : > { %p1751_p4 = por %p1998_p1, %p42_p0  ;;  %p142_p7 = scmp.lt.s32.totalorder %s1670_s18, 3 }
   0xb   : > { %p1756_p6 = por %p135_p3, %p42_p0  ;;  %s1672_s24 = smov [#allocation5]  }
   0xc   : > { %s2002_s21 = scalar_select %p1751_p4, 1, 0 }
   0xd   : > { %s2003_s22 = scalar_select %p1756_p6, 1, 0 }
   0xe   : > { %p1761_p8 = pnand %p1259_p5, %p142_p7  ;;  %s154_s25 = sshll.u32 %s1672_s24, 4  ;;  %s155_s25 = int_to_ptr.vmem [resolvable:$true] %s154_s25 }
   0xf   : > { %s1673_s27 = smov [#allocation7]   ;;  %s1674_s29 = smov [#allocation8]  }
  0x10   : > { %s2004_s23 = scalar_select %p1761_p8, 1, 0 }
  0x11   : > { %p1394_p9 = pneg %p1761_p8  ;;  %s167_s28 = sshll.u32 %s1673_s27, 4  ;;  %s168_s28 = int_to_ptr.vmem [resolvable:$true] %s167_s28 }
  0x12   : > { %s181_s30 = sshll.u32 %s1674_s29, 4  ;;  %s1503_s5 = scalar_lea.vmem %s155_s25, 512  ;;  %s182_s30 = int_to_ptr.vmem [resolvable:$true] %s181_s30 }
  0x13   : > { %p1770_p11 = pnand %p1394_p9, %p1998_p1  ;;  %p1504_p13 = scmp.ne.s32.totalorder %s155_s25, %s1503_s5 }
  0x14   : > { %p1511_p5 = scmp.lt.s32.totalorder %s155_s25, %s155_s25  ;;  %p1512_p7 = scmp.lt.s32.totalorder %s1503_s5, %s1503_s5 }
  0x15   : > { %p1494_p12 = pneg %p1770_p11 }
  0x16   : > { %p1513_p9 = por %p1512_p7, %p1511_p5 }
  0x17   : > { %p1506_p0 = pnand %p1504_p13, %p1494_p12 }
  0x19   : > { %p1507_p3 = pneg %p1506_p0 }
  0x1b   : > { %p1514_p10 = pnand %p1513_p9, %p1507_p3 }
  0x1d   : > { %1517 = shalt.err (!%p1514_p10)
}
  0x1e   : > { %s1675_s6 = smov 128   ;;  %s1676_s7 = smov 8  }
  0x1f   : > { %1397 = dma.hbm_to_vmem [thread:$0]  (!%p1770_p11), %s1994_s1, 512, %s155_s25, [#allocation6], %s1675_s6, %s1675_s6, %s1676_s7  }
  0x20   : > { %s1529_s10 = scalar_lea.vmem %s168_s28, 512  ;;  %p1537_p2 = scmp.lt.s32.totalorder %s168_s28, %s168_s28 }
  0x21   : > { %p1530_p1 = scmp.ne.s32.totalorder %s168_s28, %s1529_s10  ;;  %p1538_p6 = scmp.lt.s32.totalorder %s1529_s10, %s1529_s10 }
  0x23   : > { %p1532_p13 = pnand %p1530_p1, %p1494_p12  ;;  %p1539_p5 = por %p1538_p6, %p1537_p2 }
  0x25   : > { %p1533_p0 = pneg %p1532_p13 }
  0x27   : > { %p1540_p3 = pnand %p1539_p5, %p1533_p0 }
  0x29   : > { %1543 = shalt.err (!%p1540_p3)
}
  0x2a   : > { %1400 = dma.hbm_to_vmem [thread:$0]  (!%p1770_p11), %s1995_s2, 512, %s168_s28, [#allocation6], %s1675_s6, %s1675_s6, %s1676_s7  }
  0x2b   : > { %s1555_s13 = scalar_lea.vmem %s182_s30, 128  ;;  %p1563_p9 = scmp.lt.s32.totalorder %s182_s30, %s182_s30 }
  0x2c   : > { %p1556_p10 = scmp.ne.s32.totalorder %s182_s30, %s1555_s13  ;;  %p1564_p13 = scmp.lt.s32.totalorder %s1555_s13, %s1555_s13 }
  0x2e   : > { %p1558_p7 = pnand %p1556_p10, %p1494_p12  ;;  %p1565_p4 = por %p1564_p13, %p1563_p9 }
  0x30   : > { %p1559_p1 = pneg %p1558_p7 }
  0x32   : > { %p1566_p2 = pnand %p1565_p4, %p1559_p1 }
  0x34   : > { %1569 = shalt.err (!%p1566_p2)
}
  0x35   : > { %1403 = dma.hbm_to_vmem [thread:$0]  (!%p1770_p11), %s1996_s3, 128, %s182_s30, [#allocation9]  }
  0x36   : > { %s1801_s24 = sadd.s32 1, %s1670_s18   ;;  %s29_s26 = sadd.s32 1, %s1666_s17 }
  0x37   : > { %s26_s25 = ssub.s32 %s1670_s18, %s1801_s24  ;;  %p36_p6 = scmp.ne.s32.totalorder %s1666_s17, %s1662_s16 }
  0x38   : > { %p27_p4 = scmp.eq.s32.totalorder %s26_s25, 0  ;;  %p37_p12 = scmp.eq.s32.totalorder %s1670_s18, 0 }
  0x39   : > { %p1415_p0 = scmp.lt.s32.totalorder %s1670_s18, 2  ;;  %p2006_p3 = scmp.eq.s32.totalorder %s1742_s19, 1 }
  0x3a   : > { %s1811_s27 = scalar_select %p27_p4, %s1666_s17, %s29_s26  }
  0x3b   : > { %p38_p5 = por %p37_p12, %p36_p6  ;;  %p1815_p10 = por %p2006_p3, %p36_p6 }
  0x3c   : > { %s192_s29 = sand.u32 1, %s1666_s17   ;;  %s1265_s5 = sshll.u32 %s1670_s18, 7 }
  0x3d   : > { %s2007_s28 = scalar_select %p1815_p10, 1, 0 }
  0x3e   : > { %s1264_s30 = sshll.u32 %s192_s29, 3  ;;  %s1824_s8 = scalar_lea.hbm %s1993_s0, %s1265_s5 }
  0x3f   : > { %s196_s9 = scalar_lea.vmem [#allocation2], %s1264_s30  ;;  %p1826_p11 = pnand %p1415_p0, %p38_p5 }
  0x40   : > { %s203_s10 = sshll.u32 %s196_s9, 4  ;;  %s193_s12 = scalar_lea.sflag [#allocation3], %s192_s29  ;;  %s204_s10 = int_to_ptr.vmem [resolvable:$true] %s203_s10 }
  0x41   : > { %s1570_s13 = scalar_lea.hbm %s1824_s8, 128  ;;  %p1572_p1 = pneg %p1826_p11 }
  0x42   : > { %p1571_p7 = scmp.ne.s32.totalorder %s1824_s8, %s1570_s13  ;;  %s1575_s25 = scalar_lea.hbm %s1993_s0, 256 }
  0x43   : > { %p1576_p2 = scmp.lt.s32.totalorder %s1824_s8, %s1993_s0  ;;  %p1577_p4 = scmp.lt.s32.totalorder %s1575_s25, %s1570_s13 }
  0x44   : > { %p1573_p9 = pnand %p1572_p1, %p1571_p7 }
  0x45   : > { %p1578_p6 = por %p1577_p4, %p1576_p2 }
  0x46   : > { %p1574_p13 = pneg %p1573_p9 }
  0x48   : > { %p1579_p12 = pnand %p1578_p6, %p1574_p13 }
  0x4a   : > { %1582 = shalt.err (!%p1579_p12)
}
  0x4b   : > { %s1583_s30 = scalar_lea.vmem %s204_s10, 128  ;;  %s1677_s29 = smov [#allocation2]  }
  0x4c   : > { %p1584_p0 = scmp.ne.s32.totalorder %s204_s10, %s1583_s30  ;;  %s1588_s6 = sshll.u32 %s1677_s29, 4  ;;  %s1589_s6 = int_to_ptr.vmem [resolvable:$false] %s1588_s6 }
  0x4d   : > { %s1590_s7 = scalar_lea.vmem %s1589_s6, 256  ;;  %p1591_p7 = scmp.lt.s32.totalorder %s204_s10, %s1589_s6 }
  0x4e   : > { %p1586_p5 = pnand %p1584_p0, %p1572_p1  ;;  %p1592_p9 = scmp.lt.s32.totalorder %s1590_s7, %s1583_s30 }
  0x50   : > { %p1587_p3 = pneg %p1586_p5  ;;  %p1593_p10 = por %p1592_p9, %p1591_p7 }
  0x52   : > { %p1594_p8 = pnand %p1593_p10, %p1587_p3 }
  0x54   : > { %1597 = shalt.err (!%p1594_p8)
}
  0x55   : > { %1407 = dma.hbm_to_vmem [thread:$0]  (!%p1826_p11), %s1824_s8, 128, %s204_s10, %s193_s12  }
  0x56   : > { %p2009_p13 = scmp.ne.s32.totalorder %s2004_s23, 0 }
  0x57   : > { %s1847_s9 = sand.u32 (!%p2009_p13), 1, %s1662_s16   ;;  %p2010_p10 = scmp.ne.s32.totalorder (!%p2009_p13), %s2002_s21, 0 }
  0x58   : > { %212 = sbr.rel (%p2009_p13) target bundleno = 2285 (0x8ed), region = 36  ;;  %s1267_s13 = sshll.u32 (!%p2009_p13), %s1847_s9, 3 }
  0x59   : > { %s215_s14 = scalar_lea.sflag (!%p2009_p13), [#allocation3], %s1847_s9  ;;  %s218_s20 = scalar_lea.vmem (!%p2009_p13), [#allocation2], %s1267_s13 }
  0x5d   : > { %1641 = dma.done.wait (%p2010_p10), %s215_s14, 128  }
  0x5e   : > { %1643 = vsyncadd (%p2010_p10), %s215_s14, 4294967168  ;;  %p2011_p8 = scmp.eq.s32.totalorder %s1742_s19, 0 }
  0x60   : > { %1645 = dma.done.wait (%p2011_p8), [#allocation6], 1024   ;;  %p2012_p11 = pmov %p2011_p8 }
  0x61   : > { %p2013_p1 = pmov %p2011_p8 }
  0x62   : > { %1647 = vsyncadd (%p2012_p11), [#allocation6], 4294966272 }
  0x63   : > { %1649 = dma.done.wait (%p2013_p1), [#allocation9], 128   ;;  %p2014_p2 = pmov %p2013_p1 }
  0x64   : > { %v335_v0 = vlaneseq  ;;  %v1678_v1 = vmov 0.0   ;;  %vm1679_vm0 = vmmov 0   ;;  %v260_v4 = vld [vmem:[#allocation5 + $0x18] sm:$0xff]  ;;  %v259_v5 = vld [vmem:[#allocation5 + $0x10] sm:$0xff]  ;;  %v1874_v6 = vld [vmem:[#allocation8] sm:$0xff]  ;;  %s1680_s21 = smov 32  }
  0x65   : > { %1651 = vsyncadd (%p2014_p2), [#allocation9], 4294967168  ;;  %1316 = vmatprep.subr.mxu0 %v1678_v1  ;;  %1324 = vmatprep.mubr.msk.f32.mxu0 %vm1679_vm0, %v1678_v1  ;;  %v258_v7 = vld [vmem:[#allocation5 + $0x8] sm:$0xff]  ;;  %v257_v9 = vld [vmem:[#allocation5] sm:$0xff]  ;;  %vm261_vm1 = vcmask 261120   ;;  %s1681_s23 = smov 96  }
  0x66   : > { %v1868_v2 = vshrl.u32 %v335_v0, 7  ;;  %1327 = vmatprep.subr.mxu1 %v1678_v1  ;;  %1329 = vmatprep.mubr.msk.f32.mxu1 %vm1679_vm0, %v1678_v1  ;;  %v1879_v10 = vld [vmem:[%s218_s20] sm:$0xff]  ;;  %vm362_vm2 = vcmask 64512   ;;  %s1682_s8 = smov 64   ;;  %s1683_s10 = smov 88   ;;  %vm1034_vm3 = vcmask 130048  }
  0x67   : > { %1317 = vmatpush3.msra.mxu0 %v260_v4  ;;  %s1684_s11 = smov 120   ;;  %s1685_s12 = smov 80   ;;  %vm1036_vm4 = vcmask 195584  }
  0x68   : > { %v342_v3 = vsub.s32 1, %v1868_v2  ;;  %1318 = vmatprep.subr.mxu0 %v1678_v1  ;;  %v337_v15 = vsub.s32 0, %v1868_v2  ;;  %v351_v23 = vsub.s32 2, %v1868_v2  ;;  %s1686_s25 = smov 112   ;;  %s1687_s26 = smov 104  }
  0x69   : > { %1319 = vmatpush3.msra.mxu0 %v259_v5  ;;  %s1688_s5 = smov 72   ;;  %s1689_s30 = smov 56  }
  0x6a   : > { %v343_v8 = vrot.slane %v1874_v6, %v342_v3  ;;  %1320 = vmatprep.subr.mxu0 %v1678_v1  ;;  %v338_v16 = vrot.slane %v1874_v6, %v337_v15  ;;  %v352_v24 = vrot.slane %v1874_v6, %v351_v23  ;;  %s1690_s29 = smov 48   ;;  %s1691_s6 = smov 40   ;;  %v1038_v23 = vld [vmem:[#allocation7] sm:$0xff] }
  0x6b   : > { %1321 = vmatpush3.msra.mxu0 %v258_v7  ;;  %s1692_s7 = smov 8   ;;  %s1693_s14 = smov 16  }
  0x6c   : > { %345 = vrot.lane.b32.xlu0 %v343_v8, %s1680_s21  ;;  %1322 = vmatprep.subr.mxu0 %v1678_v1  ;;  %s1694_s20 = smov 24   ;;  %s1287_s21 = sshll.u32 %s1742_s19, 7 }
  0x6d   : > { %1323 = vmatpush3.msra.mxu0 %v257_v9  ;;  %p2015_p6 = scmp.ne.s32.totalorder %s2007_s28, 0 }
  0x6e   : > { %1325 = vmatmul.mubr.msk.f32.vlgmr.msra.gmra.mxu0 %vm261_vm1, %v1879_v10  ;;  %1347 = vmatprep.subr.mxu0 %v1678_v1 }
  0x6f   : > { %1349 = vmatprep.mubr.msk.f32.mxu0 %vm1679_vm0, %v1678_v1 }
  0xde   : > { %v346_v11 = vpop.permute.xlu0 %345 }
 0x12e   : > { %v331_v12 = vpop.f32.mrf.mxu0 }
 0x12f   : > { %v348_v13 = vadd.f32 %v346_v11, %v331_v12  ;;  %v339_v17 = vadd.f32 %v338_v16, %v331_v12 }
 0x130   : > { %v1326_v14 = vpop.f32.mrf.mxu0 }
 0x131   : > { %360 = vrot.lane.b32.xlu0 %v348_v13, %s1681_s23  ;;  %v358_v19 = vmul.f32 0.35355338, %v339_v17  ;;  %s254_s23 = scalar_lea.vmem [#allocation10], %s1267_s13 }
 0x1a3   : > { %v361_v18 = vpop.permute.xlu0 %360 }
 0x1a4   : > { %1328 = vmatpush3.xpose.msk.msra.mxu1 %vm362_vm2, %v361_v18 }
 0x1a5   : > { %1332 = vmatprep.subr.mxu1 %v1678_v1 }
 0x1a7   : > { %1330 = vmatmul.mubr.msk.f32.vlgmr.msra.gmra.mxu1 %vm362_vm2, %v358_v19 }
 0x1a8   : > { %1334 = vmatprep.mubr.msk.f32.mxu1 %vm1679_vm0, %v1678_v1 }
 0x267   : > { %v434_v20 = vpop.f32.mrf.mxu1 }
 0x268   : > { %v438_v21 = vsel %vm362_vm2, %v434_v20, -inf }
 0x269   : > { %439 = vmax.xlane.f32.xlu1 %v438_v21  ;;  %v1331_v22 = vpop.f32.mrf.mxu1  ;;  %v1040_v21 = vld [vmem:[#allocation7 + $0x10] sm:$0xff] }
 0x26a   : > { %v1039_v22 = vld [vmem:[#allocation7 + $0x8] sm:$0xff] }
 0x27a   : > { %354 = vrot.lane.b32.xlu1 %v352_v24, %s1682_s8 }
 0x2f2   : > { %v440_v25 = vpop.xlane.xlu1 %439 }
 0x2f3   : > { %v441_v26 = vsub.f32 %v434_v20, %v440_v25  ;;  %v1041_v20 = vld [vmem:[#allocation7 + $0x18] sm:$0xff] }
 0x2f5   : > { %v442_v27 = vmul.f32 1.442695, %v441_v26 }
 0x2f6   : > { %v355_v28 = vpop.permute.xlu1 %354 }
 0x2f7   : > { %1474 = vpow2.f32 %v442_v27  ;;  %v1897_v29 = vadd.f32 %v355_v28, %v331_v12 }
 0x2f9   : > { %450 = vrot.lane.b32.xlu1 %v1897_v29, %s1682_s8  ;;  %s1159_s8 = sshll.u32 %s254_s23, 4  ;;  %s1160_s8 = int_to_ptr.vmem [resolvable:$true] %s1159_s8 }
 0x2fd   : > { %528 = vrot.lane.b32.xlu1 %v348_v13, %s1683_s10 }
 0x301   : > { %526 = vrot.lane.b32.xlu1 %v358_v19, %s1684_s11 }
 0x304   : > { %v1475_v30 = vpop.eup %1474 }
 0x305   : > { %693 = vrot.lane.b32.xlu1 %v348_v13, %s1685_s12  ;;  %v444_v31 = vsel %vm362_vm2, %v1475_v30, 0.0  ;;  %s1157_s12 = scalar_lea.hbm %s1997_s4, %s1287_s21 }
 0x306   : > { %445 = vadd.xlane.f32.xlu0 %v444_v31 }
 0x309   : > { %691 = vrot.lane.b32.xlu1 %v358_v19, %s1686_s25  ;;  %s1146_s25 = scalar_lea.sflag [#allocation4], %s1847_s9 }
 0x30d   : > { %856 = vrot.lane.b32.xlu1 %v358_v19, %s1687_s26  ;;  %s1598_s26 = scalar_lea.vmem %s1160_s8, 128 }
 0x30e   : > { %p1599_p4 = scmp.ne.s32.totalorder %s1160_s8, %s1598_s26 }
 0x310   : > { %p1600_p12 = pnand %p1599_p4, %p2015_p6 }
 0x312   : > { %p1601_p0 = pneg %p1600_p12 }
 0x31c   : > { %858 = vrot.lane.b32.xlu0 %v348_v13, %s1688_s5  ;;  %s1695_s5 = smov [#allocation10]  }
 0x31d   : > { %s1602_s19 = sshll.u32 %s1695_s5, 4  ;;  %s1603_s19 = int_to_ptr.vmem [resolvable:$false] %s1602_s19 }
 0x31e   : > { %s1604_s13 = scalar_lea.vmem %s1603_s19, 256  ;;  %p1605_p5 = scmp.lt.s32.totalorder %s1160_s8, %s1603_s19 }
 0x31f   : > { %p1606_p3 = scmp.lt.s32.totalorder %s1604_s13, %s1598_s26 }
 0x321   : > { %p1607_p7 = por %p1606_p3, %p1605_p5 }
 0x323   : > { %p1608_p9 = pnand %p1607_p7, %p1601_p0 }
 0x36b   : > { %v451_v32 = vpop.permute.xlu1 %450 }
 0x36c   : > { %1333 = vmatpush3.msra.mxu1 %v451_v32 }
 0x36d   : > { %1337 = vmatprep.subr.mxu1 %v1678_v1 }
 0x36f   : > { %v529_v33 = vpop.permute.xlu1 %528 }
 0x373   : > { %v527_v34 = vpop.permute.xlu1 %526 }
 0x377   : > { %v694_v35 = vpop.permute.xlu1 %693 }
 0x378   : > { %1348 = vmatpush3.xpose.msk.msra.mxu0 %vm362_vm2, %v694_v35  ;;  %v1044_v35 = vsub.s32 3, %v1868_v2 }
 0x379   : > { %1357 = vmatprep.subr.mxu0 %v1678_v1 }
 0x37b   : > { %v692_v36 = vpop.permute.xlu1 %691 }
 0x37c   : > { %1350 = vmatmul.mubr.msk.f32.vlgmr.msra.gmra.mxu0 %vm362_vm2, %v692_v36  ;;  %v1045_v36 = vrot.slane %v1874_v6, %v1044_v35 }
 0x37d   : > { %1359 = vmatprep.mubr.msk.f32.mxu0 %vm1679_vm0, %v1678_v1 }
 0x37f   : > { %v857_v39 = vpop.permute.xlu1 %856 }
 0x38f   : > { %v446_v37 = vpop.xlane.xlu0 %445 }
 0x390   : > { %1476 = vrcp.f32 %v446_v37 }
 0x393   : > { %v859_v38 = vpop.permute.xlu0 %858 }
 0x394   : > { %1358 = vmatpush3.xpose.msk.msra.mxu0 %vm362_vm2, %v859_v38 }
 0x395   : > { %1367 = vmatprep.subr.mxu0 %v1678_v1 }
 0x397   : > { %1360 = vmatmul.mubr.msk.f32.vlgmr.msra.gmra.mxu0 %vm362_vm2, %v857_v39 }
 0x398   : > { %1375 = vmatprep.mubr.msk.f32.mxu0 %vm1679_vm0, %v1678_v1  ;;  %1368 = vmatpush3.msra.mxu0 %v1041_v20 }
 0x399   : > { %1369 = vmatprep.subr.mxu0 %v1678_v1 }
 0x39a   : > { %1370 = vmatpush3.msra.mxu0 %v1040_v21 }
 0x39b   : > { %1371 = vmatprep.subr.mxu0 %v1678_v1 }
 0x39c   : > { %1372 = vmatpush3.msra.mxu0 %v1039_v22 }
 0x39d   : > { %v1477_v40 = vpop.eup %1476  ;;  %1373 = vmatprep.subr.mxu0 %v1678_v1 }
 0x39e   : > { %v448_v41 = vmul.f32 %v1477_v40, %v1475_v30  ;;  %1374 = vmatpush3.msra.mxu0 %v1038_v23 }
 0x3a0   : > { %1335 = vmatmul.mubr.msk.f32.vlgmr.msra.gmra.mxu1 %vm362_vm2, %v448_v41 }
 0x3a1   : > { %1338 = vmatpush3.xpose.msk.msra.mxu1 %vm362_vm2, %v529_v33  ;;  %1339 = vmatprep.mubr.msk.f32.mxu1 %vm1679_vm0, %v1678_v1 }
 0x3a2   : > { %1342 = vmatprep.subr.mxu1 %v1678_v1 }
 0x3a4   : > { %1340 = vmatmul.mubr.msk.f32.vlgmr.msra.gmra.mxu1 %vm362_vm2, %v527_v34 }
 0x3a5   : > { %1344 = vmatprep.mubr.msk.f32.mxu1 %vm1679_vm0, %v1678_v1 }
 0x43c   : > { %v765_v42 = vpop.f32.mrf.mxu0 }
 0x43d   : > { %v769_v43 = vsel %vm362_vm2, %v765_v42, -inf }
 0x43e   : > { %770 = vmax.xlane.f32.xlu0 %v769_v43  ;;  %v1351_v44 = vpop.f32.mrf.mxu0 }
 0x457   : > { %v930_v45 = vpop.f32.mrf.mxu0 }
 0x458   : > { %v934_v52 = vsel %vm362_vm2, %v930_v45, -inf }
 0x459   : > { %v1361_v46 = vpop.f32.mrf.mxu0 }
 0x460   : > { %v1921_v47 = vpop.f32.mrf.mxu1 }
 0x462   : > { %v1336_v48 = vpop.f32.mrf.mxu1 }
 0x464   : > { %v600_v49 = vpop.f32.mrf.mxu1 }
 0x465   : > { %v604_v50 = vsel %vm362_vm2, %v600_v49, -inf }
 0x466   : > { %605 = vmax.xlane.f32.xlu1 %v604_v50  ;;  %v1341_v51 = vpop.f32.mrf.mxu1  ;;  %v1136_v50 = vsub.s32 4, %v1868_v2 }
 0x468   : > { %v1137_v51 = vrot.slane %v1874_v6, %v1136_v50 }
 0x46a   : > { %935 = vmax.xlane.f32.xlu1 %v934_v52 }
 0x4c7   : > { %v771_v53 = vpop.xlane.xlu0 %770 }
 0x4c8   : > { %v772_v54 = vsub.f32 %v765_v42, %v771_v53 }
 0x4ca   : > { %v773_v55 = vmul.f32 1.442695, %v772_v54 }
 0x4cc   : > { %1478 = vpow2.f32 %v773_v55 }
 0x4d9   : > { %v1479_v56 = vpop.eup %1478 }
 0x4da   : > { %v775_v57 = vsel %vm362_vm2, %v1479_v56, 0.0 }
 0x4db   : > { %776 = vadd.xlane.f32.xlu1 %v775_v57 }
 0x4ec   : > { %615 = vrot.lane.b32.xlu1 %v1897_v29, %s1689_s30 }
 0x4ef   : > { %v606_v58 = vpop.xlane.xlu1 %605 }
 0x4f0   : > { %v607_v62 = vsub.f32 %v600_v49, %v606_v58 }
 0x4f2   : > { %v608_v63 = vmul.f32 1.442695, %v607_v62 }
 0x4f3   : > { %v936_v59 = vpop.xlane.xlu1 %935 }
 0x4f4   : > { %v937_v60 = vsub.f32 %v930_v45, %v936_v59 }
 0x4f6   : > { %v938_v61 = vmul.f32 1.442695, %v937_v60 }
 0x4f8   : > { %1480 = vpow2.f32 %v938_v61 }
 0x4f9   : > { %1482 = vpow2.f32 %v608_v63 }
 0x505   : > { %v1481_v0 = vpop.eup %1480 }
 0x506   : > { %v940_v3 = vsel %vm362_vm2, %v1481_v0, 0.0  ;;  %v1483_v4 = vpop.eup %1482 }
 0x507   : > { %941 = vadd.xlane.f32.xlu0 %v940_v3  ;;  %v610_v5 = vsel %vm362_vm2, %v1483_v4, 0.0 }
 0x510   : > { %611 = vadd.xlane.f32.xlu1 %v610_v5 }
 0x51d   : > { %780 = vrot.lane.b32.xlu0 %v1897_v29, %s1690_s29 }
 0x521   : > { %945 = vrot.lane.b32.xlu1 %v1897_v29, %s1691_s6 }
 0x564   : > { %v777_v7 = vpop.xlane.xlu1 %776 }
 0x568   : > { %v616_v8 = vpop.permute.xlu1 %615 }
 0x569   : > { %1343 = vmatpush3.msra.mxu1 %v616_v8 }
 0x56a   : > { %1352 = vmatprep.subr.mxu1 %v1678_v1 }
 0x590   : > { %v942_v11 = vpop.xlane.xlu0 %941 }
 0x594   : > { %v781_v15 = vpop.permute.xlu0 %780 }
 0x599   : > { %v612_v9 = vpop.xlane.xlu1 %611 }
 0x59a   : > { %1484 = vrcp.f32 %v612_v9 }
 0x59b   : > { %1486 = vrcp.f32 %v777_v7 }
 0x59c   : > { %1488 = vrcp.f32 %v942_v11 }
 0x59d   : > { %v946_v18 = vpop.permute.xlu1 %945 }
 0x5a7   : > { %v1485_v12 = vpop.eup %1484 }
 0x5a8   : > { %v614_v13 = vmul.f32 %v1485_v12, %v1483_v4  ;;  %v1487_v14 = vpop.eup %1486 }
 0x5a9   : > { %v779_v16 = vmul.f32 %v1487_v14, %v1479_v56  ;;  %v1489_v17 = vpop.eup %1488 }
 0x5aa   : > { %1345 = vmatmul.mubr.msk.f32.vlgmr.msra.gmra.mxu1 %vm362_vm2, %v614_v13  ;;  %v944_v19 = vmul.f32 %v1489_v17, %v1481_v0 }
 0x5ab   : > { %1353 = vmatpush3.msra.mxu1 %v781_v15  ;;  %1354 = vmatprep.mubr.msk.f32.mxu1 %vm1679_vm0, %v1678_v1 }
 0x5ac   : > { %1362 = vmatprep.subr.mxu1 %v1678_v1 }
 0x5ae   : > { %1355 = vmatmul.mubr.msk.f32.vlgmr.msra.gmra.mxu1 %vm362_vm2, %v779_v16 }
 0x5af   : > { %1363 = vmatpush3.msra.mxu1 %v946_v18  ;;  %1364 = vmatprep.mubr.msk.f32.mxu1 %vm1679_vm0, %v1678_v1 }
 0x5b2   : > { %1365 = vmatmul.mubr.msk.f32.vlgmr.msra.gmra.mxu1 %vm362_vm2, %v944_v19 }
 0x66a   : > { %v687_v24 = vpop.f32.mrf.mxu1 }
 0x66b   : > { %1022 = vrot.lane.b32.xlu1 %v687_v24, %s1692_s7 }
 0x66c   : > { %v1346_v25 = vpop.f32.mrf.mxu1 }
 0x66e   : > { %v852_v26 = vpop.f32.mrf.mxu1 }
 0x66f   : > { %1026 = vrot.lane.b32.xlu0 %v852_v26, %s1693_s14 }
 0x670   : > { %v1356_v27 = vpop.f32.mrf.mxu1 }
 0x672   : > { %v1017_v28 = vpop.f32.mrf.mxu1 }
 0x673   : > { %1030 = vrot.lane.b32.xlu1 %v1017_v28, %s1694_s20 }
 0x674   : > { %v1366_v29 = vpop.f32.mrf.mxu1 }
 0x6dd   : > { %v1023_v30 = vpop.permute.xlu1 %1022 }
 0x6de   : > { %v1033_v1 = vsel %vm362_vm2, %v1921_v47, %v1023_v30 }
 0x6e1   : > { %v1027_v31 = vpop.permute.xlu0 %1026 }
 0x6e2   : > { %v1035_v32 = vsel %vm1034_vm3, %v1033_v1, %v1027_v31 }
 0x6e5   : > { %v1031_v33 = vpop.permute.xlu1 %1030 }
 0x6e6   : > { %v1037_v34 = vsel %vm1036_vm4, %v1035_v32, %v1031_v33 }
 0x6e7   : > { %1376 = vmatmul.mubr.msk.f32.vlgmr.msra.gmra.mxu0 %vm261_vm1, %v1037_v34 }
 0x7a7   : > { %v1115_v37 = vpop.f32.mrf.mxu0 }
 0x7a8   : > { %v1116_v38 = vadd.f32 %v1115_v37, %v1045_v36 }
 0x7a9   : > { %v1377_v39 = vpop.f32.mrf.mxu0 }
 0x7aa   : > { %v1119_v40 = vadd.f32 %v1116_v38, %v1879_v10  ;;  %v1141_v10 = vsub.s32 5, %v1868_v2 }
 0x7ac   : > { %v1120_v41 = vsel %vm261_vm1, %v1119_v40, 0.0  ;;  %v1142_v54 = vrot.slane %v1874_v6, %v1141_v10 }
 0x7ad   : > { %1121 = vadd.xlane.f32.xlu0 %v1120_v41 }
 0x836   : > { %v1122_v42 = vpop.xlane.xlu0 %1121 }
 0x837   : > { %v1124_v43 = vmul.f32 0.03125, %v1122_v42 }
 0x839   : > { %v1125_v44 = vsub.f32 %v1119_v40, %v1124_v43 }
 0x83b   : > { %v1126_v45 = vmul.f32 %v1125_v44, %v1125_v44 }
 0x83d   : > { %v1127_v46 = vsel %vm261_vm1, %v1126_v45, 0.0 }
 0x83e   : > { %1128 = vadd.xlane.f32.xlu1 %v1127_v46 }
 0x8c7   : > { %v1129_v47 = vpop.xlane.xlu1 %1128 }
 0x8c8   : > { %v1130_v48 = vmul.f32 0.03125, %v1129_v47 }
 0x8ca   : > { %v1131_v49 = vadd.f32 1e-05, %v1130_v48 }
 0x8cc   : > { %1490 = vrsqrt.f32 %v1131_v49 }
 0x8d9   : > { %v1491_v52 = vpop.eup %1490 }
 0x8da   : > { %v1133_v53 = vmul.f32 %v1491_v52, %v1125_v44 }
 0x8dc   : > { %v1138_v55 = vmul.f32 %v1137_v51, %v1133_v53 }
 0x8de   : > { %v1143_v56 = vadd.f32 %v1142_v54, %v1138_v55 }
 0x8e0   : > { %1144 = vst.msk [vmem:[%s254_s23] sm:$0xff] %vm261_vm1, %v1143_v56 }
 0x8e1   : > { %1611 = shalt.err (!%p1608_p9)
}
 0x8e2   : > { %s1612_s30 = scalar_lea.hbm %s1157_s12, 128  ;;  %s1616_s6 = scalar_lea.hbm %s1997_s4, 256 }
 0x8e3   : > { %p1613_p13 = scmp.ne.s32.totalorder %s1157_s12, %s1612_s30  ;;  %p1617_p11 = scmp.lt.s32.totalorder %s1157_s12, %s1997_s4 }
 0x8e4   : > { %p1618_p1 = scmp.lt.s32.totalorder %s1616_s6, %s1612_s30 }
 0x8e5   : > { %p1614_p10 = pnand %p1613_p13, %p2015_p6 }
 0x8e6   : > { %p1619_p2 = por %p1618_p1, %p1617_p11 }
 0x8e7   : > { %p1615_p8 = pneg %p1614_p10 }
 0x8e9   : > { %p1620_p4 = pnand %p1619_p2, %p1615_p8 }
 0x8eb   : > { %1623 = shalt.err (!%p1620_p4)
}
 0x8ec   : > { %1392 = dma.vmem_to_hbm [thread:$0]  (%p2015_p6), %s1160_s8, 128, %s1157_s12, %s1146_s25  }
 0x8ed PF: > { %s1171_s20 = sand.u32 1, %s1658_s15   ;;  %p2016_p12 = scmp.ne.s32.totalorder %s2003_s22, 0 }
 0x8ee   : > { %p2017_p0 = scmp.ge.s32.totalorder %s1670_s18, 2  ;;  %s1172_s21 = scalar_lea.sflag [#allocation4], %s1171_s20 }
 0x8f0   : > { %p1409_p5 = pnand %p2017_p0, %p2016_p12 }
 0x8f2   : > { %p1410_p3 = pneg %p1409_p5 }
 0x8f4   : > { %1653 = dma.done.wait (%p1410_p3), %s1172_s21, 128  }
 0x8f5   : > { %1655 = vsyncadd (%p1410_p3), %s1172_s21, 4294967168  ;;  %p19_p7 = scmp.ge.s32.totalorder %s1801_s24, 4   ;;  %s2018_s15 = smov %s1662_s16 }
 0x8f6   : > { %s2019_s16 = smov %s1666_s17  ;;  %s2020_s17 = smov %s1811_s27 }
 0x8f7   : > { %s2021_s18 = smov %s1801_s24  ;;  %21 = sbr.rel (!%p19_p7) target bundleno = 7 (0x7), region = 93 }
 0x8fc   :  { %1177 = vsyncpa [#allocation3], 1 }
 0x8fd   :  { %1179 = vsyncpa [#allocation3 + $0x1], 1 }
 0x8fe   :  { %1180 = vsyncpa [#allocation6], 1 }
 0x8ff   :  { %1181 = vsyncpa [#allocation9], 1 }
 0x900   :  { %1182 = vsyncpa [#allocation4], 1 }
 0x901   :  { %1184 = vsyncpa [#allocation4 + $0x1], 1 }

</bundles_post_ra>
